<compile_context>
chip_gen: v5e
topology: v5e:2x2
jax: 0.10.0
libtpu: 0.0.40
codegen_flags: <defaults>
</compile_context>

<pallas_src>
import functools

import jax
import jax.numpy as jnp
import numpy as np
from jax.experimental import pallas as pl
from jax.experimental.pallas import tpu as pltpu


def _round_up(v, m):
    return (v + m - 1) // m * m


# ----------------------------- Pallas kernel ------------------------------ #
def _matmul_kernel(a_ref, b_ref, o_ref, acc_ref):
    # Grid = (M//tm, N//tn, K//tk); reduction axis (k) is last.
    @pl.when(pl.program_id(2) == 0)
    def _():
        acc_ref[...] = jnp.zeros_like(acc_ref)

    acc_ref[...] += jnp.dot(
        a_ref[...], b_ref[...], preferred_element_type=jnp.float32
    )

    @pl.when(pl.program_id(2) == pl.num_programs(2) - 1)
    def _():
        o_ref[...] = acc_ref[...].astype(o_ref.dtype)


def _tiled_matmul(a, b, out_dtype, *, tm=256, tk=256, tn=128):
    """C = a @ b with bf16 operands, f32 accumulation, tiled over the MXU.

    a: (M, K), b: (K, N); M, K multiples of tm/tk, N multiple of tn.
    """
    M, K = a.shape
    K2, N = b.shape
    assert K == K2 and M % tm == 0 and K % tk == 0 and N % tn == 0

    cost = pl.CostEstimate(
        flops=2 * M * N * K,
        transcendentals=0,
        bytes_accessed=int(a.size * a.dtype.itemsize
                           + b.size * b.dtype.itemsize
                           + M * N * jnp.dtype(out_dtype).itemsize),
    )
    return pl.pallas_call(
        _matmul_kernel,
        out_shape=jax.ShapeDtypeStruct((M, N), out_dtype),
        grid_spec=pltpu.PrefetchScalarGridSpec(
            num_scalar_prefetch=0,
            grid=(M // tm, N // tn, K // tk),
            in_specs=[
                pl.BlockSpec((tm, tk), lambda i, j, k: (i, k)),
                pl.BlockSpec((tk, tn), lambda i, j, k: (k, j)),
            ],
            out_specs=pl.BlockSpec((tm, tn), lambda i, j, k: (i, j)),
            scratch_shapes=[pltpu.VMEM((tm, tn), jnp.float32)],
        ),
        compiler_params=pltpu.CompilerParams(
            dimension_semantics=("parallel", "parallel", "arbitrary"),
            vmem_limit_bytes=48 * 1024 * 1024,
        ),
        cost_estimate=cost,
    )(a, b)


# ------------------------------ JAX glue ----------------------------------- #
def build_normalized_adjacency(edge_index, num_nodes, dtype=jnp.float32):
    """Dense A[target, source] with GCNConv edge normalization (f32).

    Data-dependent scatter/gather over edge_index has no rectangular BlockSpec
    expression, so it stays in plain JAX.
    """
    row, col = edge_index[0], edge_index[1]
    deg = jnp.zeros((num_nodes,), dtype).at[col].add(1.0)
    deg_inv_sqrt = jnp.where(deg > 0, deg ** -0.5, 0.0)       # guard isolated nodes
    norm = deg_inv_sqrt[row] * deg_inv_sqrt[col]
    weights = jnp.zeros((num_nodes,), dtype).at[col].add(norm)
    safe_w = jnp.where(weights > 0, weights, 1.0)
    norm = norm / safe_w[col]
    return jnp.zeros((num_nodes, num_nodes), dtype).at[col, row].add(norm)


@functools.partial(jax.jit, static_argnames=())
def att_gcn(x, edge_index):
    """AttGCN forward: out = A @ (A @ x), lane-dense / bf16 / tiled."""
    N, F = x.shape
    TM = TK = 256   # MXU-friendly node-axis tiles (contraction >= 256)
    TN = 128        # lane-dense feature tile
    N_pad = _round_up(N, TM)
    F_pad = _round_up(F, TN)

    A = build_normalized_adjacency(edge_index, N, jnp.float32)

    # bf16 at the kernel boundary; zero padding keeps the top-left block exact.
    A_p = jnp.zeros((N_pad, N_pad), jnp.bfloat16).at[:N, :N].set(
        A.astype(jnp.bfloat16))
    x_p = jnp.zeros((N_pad, F_pad), jnp.bfloat16).at[:N, :F].set(
        x.astype(jnp.bfloat16))

    # Layer 1: h = A @ x  (h round-trips HBM in bf16 -> safe on v7x's 64 MiB VMEM)
    h = _tiled_matmul(A_p, x_p, jnp.bfloat16, tm=TM, tk=TK, tn=TN)
    # Layer 2: out = A @ h (final output in f32)
    out = _tiled_matmul(A_p, h, jnp.float32, tm=TM, tk=TK, tn=TN)
    return out[:N, :F]


# --------------------------- pure-JAX reference ---------------------------- #
def _gcn_conv_ref(x, edge_index):
    row, col = edge_index[0], edge_index[1]
    N = x.shape[0]
    deg = jnp.zeros((N,), x.dtype).at[col].add(1.0)
    deg_inv_sqrt = jnp.where(deg > 0, deg ** -0.5, 0.0)
    norm = deg_inv_sqrt[row] * deg_inv_sqrt[col]
    weights = jnp.zeros((N,), x.dtype).at[col].add(norm)
    safe_w = jnp.where(weights > 0, weights, 1.0)
    norm = norm / safe_w[col]
    msgs = norm[:, None] * x[row]
    return jnp.zeros_like(x).at[col].add(msgs)


def att_gcn_ref(x, edge_index):
    return _gcn_conv_ref(_gcn_conv_ref(x, edge_index), edge_index)


# --------------------------------- main ------------------------------------ #
if __name__ == "__main__":
    key = jax.random.PRNGKey(0)
    k_x, k_src = jax.random.split(key)

    N = 16          # number of nodes
    F = 32          # feature dim
    E_RAND = 32     # random edges in addition to self-loops

    x = jax.random.normal(k_x, (N, F), dtype=jnp.float32)

    # Deterministic graph: self-loops (every node has in-degree >= 1) + random edges.
    self_loops = jnp.arange(N, dtype=jnp.int32)
    rand_src = jax.random.randint(k_src, (E_RAND,), 0, N, dtype=jnp.int32)
    rand_dst = jax.random.randint(jax.random.fold_in(k_src, 1), (E_RAND,), 0, N,
                                  dtype=jnp.int32)
    row = jnp.concatenate([self_loops, rand_src])   # sources
    col = jnp.concatenate([self_loops, rand_dst])   # targets
    edge_index = jnp.stack([row, col], axis=0)      # [2, 48]

    out = jax.block_until_ready(att_gcn(x, edge_index))
    ref = jax.block_until_ready(att_gcn_ref(x, edge_index))

    # bf16 operands slightly perturb the normalized edge weights; accumulation
    # is f32, so a loosened tolerance vs. the f32 reference is expected.
    np.testing.assert_allclose(np.asarray(out), np.asarray(ref),
                               rtol=3e-2, atol=3e-2)

    print("KERNEL_OK")
</pallas_src>

<mosaic_0001>
module attributes {stable_mosaic.version = 11 : i64} {
  func.func @_matmul_kernel(%arg0: i32, %arg1: i32, %arg2: i32, %arg3: memref<256x256xbf16, #tpu.memory_space<vmem>>, %arg4: memref<256x128xbf16, #tpu.memory_space<vmem>>, %arg5: memref<256x128xbf16, #tpu.memory_space<vmem>>, %arg6: memref<256x128xf32, #tpu.memory_space<vmem>>) attributes {dimension_semantics = [#tpu.dimension_semantics<parallel>, #tpu.dimension_semantics<parallel>, #tpu.dimension_semantics<arbitrary>], iteration_bounds = array<i64: 1, 1, 1>, scalar_prefetch = 0 : i64, scratch_operands = 1 : i64, tpu.core_type = #tpu.core_type<tc>, window_params = [{transform_indices = @transform_0, window_bounds = array<i64: 256, 256>}, {transform_indices = @transform_1, window_bounds = array<i64: 256, 128>}, {transform_indices = @transform_2, window_bounds = array<i64: 256, 128>}]} {
    %c0_i32 = arith.constant 0 : i32
    %0 = arith.cmpi eq, %arg2, %c0_i32 : i32
    %1 = arith.extui %0 : i1 to i32
    %c0_i32_0 = arith.constant 0 : i32
    %2 = arith.cmpi ne, %1, %c0_i32_0 : i32
    scf.if %2 {
      %cst_10 = arith.constant 0.000000e+00 : f32
      %12 = vector.broadcast %cst_10 : f32 to vector<256x128xf32>
      %c0_11 = arith.constant 0 : index
      %c0_12 = arith.constant 0 : index
      %13 = vector.load %arg6[%c0_11, %c0_12] : memref<256x128xf32, #tpu.memory_space<vmem>>, vector<256x128xf32>
      tpu.vector_store %arg6[%c0_11, %c0_12], %12 {strides = array<i32>} : memref<256x128xf32, #tpu.memory_space<vmem>>, vector<256x128xf32>,
    } else {
    }
    %c0 = arith.constant 0 : index
    %c0_1 = arith.constant 0 : index
    %3 = vector.load %arg6[%c0, %c0_1] : memref<256x128xf32, #tpu.memory_space<vmem>>, vector<256x128xf32>
    %c0_2 = arith.constant 0 : index
    %c0_3 = arith.constant 0 : index
    %4 = vector.load %arg3[%c0_2, %c0_3] : memref<256x256xbf16, #tpu.memory_space<vmem>>, vector<256x256xbf16>
    %c0_4 = arith.constant 0 : index
    %c0_5 = arith.constant 0 : index
    %5 = vector.load %arg4[%c0_4, %c0_5] : memref<256x128xbf16, #tpu.memory_space<vmem>>, vector<256x128xbf16>
    %cst = arith.constant dense<0.000000e+00> : vector<256x128xf32>
    %6 = tpu.matmul %4, %5, %cst {dimension_numbers = #tpu.dot_dimension_numbers<[1], [0], [0], [1], [0, 0, 1, 1], [], []>} : vector<256x256xbf16>, vector<256x128xbf16>, vector<256x128xf32> -> vector<256x128xf32>
    %7 = arith.addf %3, %6 : vector<256x128xf32>
    %c0_6 = arith.constant 0 : index
    %c0_7 = arith.constant 0 : index
    %8 = vector.load %arg6[%c0_6, %c0_7] : memref<256x128xf32, #tpu.memory_space<vmem>>, vector<256x128xf32>
    tpu.vector_store %arg6[%c0_6, %c0_7], %7 {strides = array<i32>} : memref<256x128xf32, #tpu.memory_space<vmem>>, vector<256x128xf32>,
    %c0_i32_8 = arith.constant 0 : i32
    %9 = arith.cmpi eq, %arg2, %c0_i32_8 : i32
    %10 = arith.extui %9 : i1 to i32
    %c0_i32_9 = arith.constant 0 : i32
    %11 = arith.cmpi ne, %10, %c0_i32_9 : i32
    scf.if %11 {
      %c0_10 = arith.constant 0 : index
      %c0_11 = arith.constant 0 : index
      %12 = vector.load %arg6[%c0_10, %c0_11] : memref<256x128xf32, #tpu.memory_space<vmem>>, vector<256x128xf32>
      %13 = arith.truncf %12 : vector<256x128xf32> to vector<256x128xbf16>
      %c0_12 = arith.constant 0 : index
      %c0_13 = arith.constant 0 : index
      %14 = vector.load %arg5[%c0_12, %c0_13] : memref<256x128xbf16, #tpu.memory_space<vmem>>, vector<256x128xbf16>
      tpu.vector_store %arg5[%c0_12, %c0_13], %13 {strides = array<i32>} : memref<256x128xbf16, #tpu.memory_space<vmem>>, vector<256x128xbf16>,
    } else {
    }
    return
  }
  func.func @transform_0(%arg0: i32, %arg1: i32, %arg2: i32) -> (i32, i32) {
    %c0_i32 = arith.constant 0 : i32
    return %arg0, %arg2 : i32, i32
  }
  func.func @transform_1(%arg0: i32, %arg1: i32, %arg2: i32) -> (i32, i32) {
    %c0_i32 = arith.constant 0 : i32
    return %arg2, %arg1 : i32, i32
  }
  func.func @transform_2(%arg0: i32, %arg1: i32, %arg2: i32) -> (i32, i32) {
    %c0_i32 = arith.constant 0 : i32
    return %arg0, %arg1 : i32, i32
  }
}

module attributes {stable_mosaic.version = 11 : i64} {
  func.func @_matmul_kernel(%arg0: i32, %arg1: i32, %arg2: i32, %arg3: memref<256x256xbf16, #tpu.memory_space<vmem>>, %arg4: memref<256x128xbf16, #tpu.memory_space<vmem>>, %arg5: memref<256x128xf32, #tpu.memory_space<vmem>>, %arg6: memref<256x128xf32, #tpu.memory_space<vmem>>) attributes {dimension_semantics = [#tpu.dimension_semantics<parallel>, #tpu.dimension_semantics<parallel>, #tpu.dimension_semantics<arbitrary>], iteration_bounds = array<i64: 1, 1, 1>, scalar_prefetch = 0 : i64, scratch_operands = 1 : i64, tpu.core_type = #tpu.core_type<tc>, window_params = [{transform_indices = @transform_0, window_bounds = array<i64: 256, 256>}, {transform_indices = @transform_1, window_bounds = array<i64: 256, 128>}, {transform_indices = @transform_2, window_bounds = array<i64: 256, 128>}]} {
    %c0_i32 = arith.constant 0 : i32
    %0 = arith.cmpi eq, %arg2, %c0_i32 : i32
    %1 = arith.extui %0 : i1 to i32
    %c0_i32_0 = arith.constant 0 : i32
    %2 = arith.cmpi ne, %1, %c0_i32_0 : i32
    scf.if %2 {
      %cst_10 = arith.constant 0.000000e+00 : f32
      %12 = vector.broadcast %cst_10 : f32 to vector<256x128xf32>
      %c0_11 = arith.constant 0 : index
      %c0_12 = arith.constant 0 : index
      %13 = vector.load %arg6[%c0_11, %c0_12] : memref<256x128xf32, #tpu.memory_space<vmem>>, vector<256x128xf32>
      tpu.vector_store %arg6[%c0_11, %c0_12], %12 {strides = array<i32>} : memref<256x128xf32, #tpu.memory_space<vmem>>, vector<256x128xf32>,
    } else {
    }
    %c0 = arith.constant 0 : index
    %c0_1 = arith.constant 0 : index
    %3 = vector.load %arg6[%c0, %c0_1] : memref<256x128xf32, #tpu.memory_space<vmem>>, vector<256x128xf32>
    %c0_2 = arith.constant 0 : index
    %c0_3 = arith.constant 0 : index
    %4 = vector.load %arg3[%c0_2, %c0_3] : memref<256x256xbf16, #tpu.memory_space<vmem>>, vector<256x256xbf16>
    %c0_4 = arith.constant 0 : index
    %c0_5 = arith.constant 0 : index
    %5 = vector.load %arg4[%c0_4, %c0_5] : memref<256x128xbf16, #tpu.memory_space<vmem>>, vector<256x128xbf16>
    %cst = arith.constant dense<0.000000e+00> : vector<256x128xf32>
    %6 = tpu.matmul %4, %5, %cst {dimension_numbers = #tpu.dot_dimension_numbers<[1], [0], [0], [1], [0, 0, 1, 1], [], []>} : vector<256x256xbf16>, vector<256x128xbf16>, vector<256x128xf32> -> vector<256x128xf32>
    %7 = arith.addf %3, %6 : vector<256x128xf32>
    %c0_6 = arith.constant 0 : index
    %c0_7 = arith.constant 0 : index
    %8 = vector.load %arg6[%c0_6, %c0_7] : memref<256x128xf32, #tpu.memory_space<vmem>>, vector<256x128xf32>
    tpu.vector_store %arg6[%c0_6, %c0_7], %7 {strides = array<i32>} : memref<256x128xf32, #tpu.memory_space<vmem>>, vector<256x128xf32>,
    %c0_i32_8 = arith.constant 0 : i32
    %9 = arith.cmpi eq, %arg2, %c0_i32_8 : i32
    %10 = arith.extui %9 : i1 to i32
    %c0_i32_9 = arith.constant 0 : i32
    %11 = arith.cmpi ne, %10, %c0_i32_9 : i32
    scf.if %11 {
      %c0_10 = arith.constant 0 : index
      %c0_11 = arith.constant 0 : index
      %12 = vector.load %arg6[%c0_10, %c0_11] : memref<256x128xf32, #tpu.memory_space<vmem>>, vector<256x128xf32>
      %c0_12 = arith.constant 0 : index
      %c0_13 = arith.constant 0 : index
      %13 = vector.load %arg5[%c0_12, %c0_13] : memref<256x128xf32, #tpu.memory_space<vmem>>, vector<256x128xf32>
      tpu.vector_store %arg5[%c0_12, %c0_13], %12 {strides = array<i32>} : memref<256x128xf32, #tpu.memory_space<vmem>>, vector<256x128xf32>,
    } else {
    }
    return
  }
  func.func @transform_0(%arg0: i32, %arg1: i32, %arg2: i32) -> (i32, i32) {
    %c0_i32 = arith.constant 0 : i32
    return %arg0, %arg2 : i32, i32
  }
  func.func @transform_1(%arg0: i32, %arg1: i32, %arg2: i32) -> (i32, i32) {
    %c0_i32 = arith.constant 0 : i32
    return %arg2, %arg1 : i32, i32
  }
  func.func @transform_2(%arg0: i32, %arg1: i32, %arg2: i32) -> (i32, i32) {
    %c0_i32 = arith.constant 0 : i32
    return %arg0, %arg1 : i32, i32
  }
}

</mosaic_0001>

<bundles_post_ra>
// kernel: mul.1
= control target key start
LH: loop header
LB: loop body
LE: loop exit
PB: predicated region body
PF: predicated region fallthrough
CT: control target
= control target key end

     0   :  { %s34_s0 = inlined_call_operand.vmem [shape: f32[48], index: 0, kind: input, shape index: {}]   ;;  %s35_s1 = inlined_call_operand.vmem [shape: f32[48], index: 1, kind: input, shape index: {}]   ;;  %s36_s2 = inlined_call_operand.vmem [shape: f32[48], index: 2, kind: output, shape index: {}]  }
   0x1   :  { %v3_v0 = vld [vmem:[%s34_s0] sm:$0x1] }
   0x2   :  { %v4_v1 = vld [vmem:[%s35_s1] sm:$0x1] }
   0x3   :  { %v7_v2 = vmul.f32 %v4_v1, %v3_v0 }
   0x5   :  { %9 = vst [vmem:[%s36_s2] sm:$0x1] %v7_v2 }

// kernel: div.1
= control target key start
LH: loop header
LB: loop body
LE: loop exit
PB: predicated region body
PF: predicated region fallthrough
CT: control target
= control target key end

     0   :  { %s50_s0 = inlined_call_operand.vmem [shape: f32[48], index: 0, kind: input, shape index: {}]   ;;  %s51_s1 = inlined_call_operand.vmem [shape: f32[48], index: 1, kind: input, shape index: {}]   ;;  %s52_s2 = inlined_call_operand.vmem [shape: f32[48], index: 2, kind: output, shape index: {}]  }
   0x1   :  { %v4_v0 = vld [vmem:[%s51_s1] sm:$0x1] }
   0x2   :  { %24 = vrcp.f32 %v4_v0  ;;  %v18_v3 = vand.u32 2147483648, %v4_v0  ;;  %vm12_vm0 = vweird.f32 %v4_v0  ;;  %v16_v5 = vand.u32 2147483647, %v4_v0  ;;  %v3_v9 = vld [vmem:[%s50_s0] sm:$0x1] }
   0x4   :  { %v19_v7 = vor.u32 1.1754944e-38, %v18_v3  ;;  %vm17_vm3 = vcmp.eq.f32.partialorder %v16_v5, 8.507059e+37 }
   0x8   :  { %v25_v1 = vpop.eup %24 }
   0x9   :  { %v8_v2 = vmul.f32 %v25_v1, %v4_v0  ;;  %vm13_vm1 = vweird.f32 %v25_v1 }
   0xa   :  { %vm14_vm2 = vmor %vm12_vm0, %vm13_vm1 }
   0xb   :  { %v9_v4 = vsub.f32 1.0, %v8_v2 }
   0xd   :  { %v10_v6 = vmul.f32 %v25_v1, %v9_v4 }
   0xf   :  { %v11_v8 = vadd.f32 %v25_v1, %v10_v6 }
  0x11   :  { %v15_v10 = vsel %vm14_vm2, %v25_v1, %v11_v8 }
  0x12   :  { %v20_v11 = vsel %vm17_vm3, %v19_v7, %v15_v10 }
  0x13   :  { %v21_v12 = vmul.f32 %v20_v11, %v3_v9 }
  0x15   :  { %23 = vst [vmem:[%s52_s2] sm:$0x1] %v21_v12 }

// kernel: att_gcn.2
= control target key start
LH: loop header
LB: loop body
LE: loop exit
PB: predicated region body
PF: predicated region fallthrough
CT: control target
= control target key end

     0   :  { %s1398_s1 = inlined_call_operand.vmem [shape: bf16[256,128], index: 1, kind: input, shape index: {}]   ;;  %s1399_s0 = inlined_call_operand.vmem [shape: bf16[256,256], index: 0, kind: input, shape index: {}]   ;;  %s1400_s2 = inlined_call_operand.vmem [shape: bf16[256,128], index: 2, kind: output, shape index: {}]  }
   0x1   :  { %v975_v0 = vld [vmem:[%s1398_s1 + $0x38] sm:$0xff]  ;;  %v974_v2 = vld [vmem:[%s1398_s1 + $0x30] sm:$0xff]  ;;  %v973_v4 = vld [vmem:[%s1398_s1 + $0x28] sm:$0xff] }
   0x2   :  { %v983_v1 = vld [vmem:[%s1398_s1 + $0x78] sm:$0xff]  ;;  %399 = vmatpush.bf16.msra.mxu0 %v975_v0  ;;  %1079 = vmatpush.bf16.msra.mxu2 %v975_v0  ;;  %v982_v3 = vld [vmem:[%s1398_s1 + $0x70] sm:$0xff]  ;;  %v981_v5 = vld [vmem:[%s1398_s1 + $0x68] sm:$0xff] }
   0x3   :  { %488 = vmatpush.bf16.msra.mxu1 %v983_v1  ;;  %1087 = vmatpush.bf16.msra.mxu3 %v983_v1  ;;  %v972_v6 = vld [vmem:[%s1398_s1 + $0x20] sm:$0xff]  ;;  %v971_v8 = vld [vmem:[%s1398_s1 + $0x18] sm:$0xff]  ;;  %v970_v10 = vld [vmem:[%s1398_s1 + $0x10] sm:$0xff] }
   0x4   :  { %v980_v7 = vld [vmem:[%s1398_s1 + $0x60] sm:$0xff]  ;;  %v979_v9 = vld [vmem:[%s1398_s1 + $0x58] sm:$0xff]  ;;  %v978_v11 = vld [vmem:[%s1398_s1 + $0x50] sm:$0xff] }
   0x5   :  { %v969_v12 = vld [vmem:[%s1398_s1 + $0x8] sm:$0xff]  ;;  %v968_v14 = vld [vmem:[%s1398_s1] sm:$0xff]  ;;  %v754_v28 = vld [vmem:[%s1399_s0 + $0x10] sm:$0xf] }
   0x6   :  { %400 = vmatpush.bf16.msra.mxu0 %v974_v2  ;;  %1080 = vmatpush.bf16.msra.mxu2 %v974_v2  ;;  %v977_v13 = vld [vmem:[%s1398_s1 + $0x48] sm:$0xff]  ;;  %v976_v15 = vld [vmem:[%s1398_s1 + $0x40] sm:$0xff]  ;;  %v939_v29 = vld [vmem:[%s1399_s0 + $0x14] sm:$0xf0] }
   0x7   :  { %489 = vmatpush.bf16.msra.mxu1 %v982_v3  ;;  %1088 = vmatpush.bf16.msra.mxu3 %v982_v3  ;;  %v746_v16 = vld [vmem:[%s1399_s0] sm:$0xf]  ;;  %v937_v17 = vld [vmem:[%s1399_s0 + $0x4] sm:$0xf0]  ;;  %v936_v20 = vld [vmem:[%s1399_s0 + $0x4] sm:$0xf]  ;;  %v755_v36 = vor.u32 %v939_v29, %v754_v28 }
   0x8   :  { %v810_v18 = vld [vmem:[%s1399_s0 + $0x80] sm:$0xf]  ;;  %v953_v19 = vld [vmem:[%s1399_s0 + $0x84] sm:$0xf0]  ;;  %v748_v21 = vld [vmem:[%s1399_s0 + $0x8] sm:$0xf0]  ;;  %v747_v24 = vor.u32 %v937_v17, %v746_v16 }
   0x9   :  { %v952_v22 = vld [vmem:[%s1399_s0 + $0x84] sm:$0xf]  ;;  %v812_v23 = vld [vmem:[%s1399_s0 + $0x88] sm:$0xf0]  ;;  %v811_v25 = vor.u32 %v953_v19, %v810_v18  ;;  %v751_v26 = vor.u32 %v936_v20, %v748_v21  ;;  %v818_v30 = vld [vmem:[%s1399_s0 + $0x90] sm:$0xf] }
   0xa   :  { %401 = vmatpush.bf16.msra.mxu0 %v973_v4  ;;  %1081 = vmatpush.bf16.msra.mxu2 %v973_v4  ;;  %v815_v27 = vor.u32 %v952_v22, %v812_v23  ;;  %v955_v31 = vld [vmem:[%s1399_s0 + $0x94] sm:$0xf0]  ;;  %v938_v32 = vld [vmem:[%s1399_s0 + $0x14] sm:$0xf]  ;;  %v756_v33 = vld [vmem:[%s1399_s0 + $0x18] sm:$0xf0] }
   0xb   :  { %490 = vmatpush.bf16.msra.mxu1 %v981_v5  ;;  %1089 = vmatpush.bf16.msra.mxu3 %v981_v5  ;;  %v954_v34 = vld [vmem:[%s1399_s0 + $0x94] sm:$0xf]  ;;  %v820_v35 = vld [vmem:[%s1399_s0 + $0x98] sm:$0xf0]  ;;  %v819_v37 = vor.u32 %v955_v31, %v818_v30  ;;  %v759_v38 = vor.u32 %v938_v32, %v756_v33  ;;  %v762_v40 = vld [vmem:[%s1399_s0 + $0x20] sm:$0xf] }
   0xc   :  { %v823_v39 = vor.u32 %v954_v34, %v820_v35  ;;  %v941_v41 = vld [vmem:[%s1399_s0 + $0x24] sm:$0xf0]  ;;  %v826_v42 = vld [vmem:[%s1399_s0 + $0xa0] sm:$0xf]  ;;  %v940_v44 = vld [vmem:[%s1399_s0 + $0x24] sm:$0xf] }
   0xd   :  { %v957_v43 = vld [vmem:[%s1399_s0 + $0xa4] sm:$0xf0]  ;;  %v764_v45 = vld [vmem:[%s1399_s0 + $0x28] sm:$0xf0]  ;;  %v956_v46 = vld [vmem:[%s1399_s0 + $0xa4] sm:$0xf]  ;;  %v763_v48 = vor.u32 %v941_v41, %v762_v40 }
   0xe   :  { %402 = vmatpush.bf16.msra.mxu0 %v972_v6  ;;  %1082 = vmatpush.bf16.msra.mxu2 %v972_v6  ;;  %v828_v47 = vld [vmem:[%s1399_s0 + $0xa8] sm:$0xf0]  ;;  %v827_v49 = vor.u32 %v957_v43, %v826_v42  ;;  %v767_v50 = vor.u32 %v940_v44, %v764_v45  ;;  %v770_v52 = vld [vmem:[%s1399_s0 + $0x30] sm:$0xf]  ;;  %v943_v53 = vld [vmem:[%s1399_s0 + $0x34] sm:$0xf0] }
   0xf   :  { %491 = vmatpush.bf16.msra.mxu1 %v980_v7  ;;  %1090 = vmatpush.bf16.msra.mxu3 %v980_v7  ;;  %v831_v51 = vor.u32 %v956_v46, %v828_v47  ;;  %v834_v54 = vld [vmem:[%s1399_s0 + $0xb0] sm:$0xf]  ;;  %v959_v55 = vld [vmem:[%s1399_s0 + $0xb4] sm:$0xf0]  ;;  %v942_v56 = vld [vmem:[%s1399_s0 + $0x34] sm:$0xf]  ;;  %v771_v60 = vor.u32 %v943_v53, %v770_v52 }
  0x10   :  { %v772_v57 = vld [vmem:[%s1399_s0 + $0x38] sm:$0xf0]  ;;  %v958_v58 = vld [vmem:[%s1399_s0 + $0xb4] sm:$0xf]  ;;  %v835_v61 = vor.u32 %v959_v55, %v834_v54  ;;  %v778_v0 = vld [vmem:[%s1399_s0 + $0x40] sm:$0xf] }
  0x11   :  { %v836_v59 = vld [vmem:[%s1399_s0 + $0xb8] sm:$0xf0]  ;;  %v775_v62 = vor.u32 %v942_v56, %v772_v57  ;;  %v945_v1 = vld [vmem:[%s1399_s0 + $0x44] sm:$0xf0]  ;;  %v842_v2 = vld [vmem:[%s1399_s0 + $0xc0] sm:$0xf] }
  0x12   :  { %403 = vmatpush.bf16.msra.mxu0 %v971_v8  ;;  %1083 = vmatpush.bf16.msra.mxu2 %v971_v8  ;;  %v839_v63 = vor.u32 %v958_v58, %v836_v59  ;;  %v961_v3 = vld [vmem:[%s1399_s0 + $0xc4] sm:$0xf0]  ;;  %v944_v4 = vld [vmem:[%s1399_s0 + $0x44] sm:$0xf]  ;;  %v780_v5 = vld [vmem:[%s1399_s0 + $0x48] sm:$0xf0]  ;;  %v779_v8 = vor.u32 %v945_v1, %v778_v0 }
  0x13   :  { %492 = vmatpush.bf16.msra.mxu1 %v979_v9  ;;  %1091 = vmatpush.bf16.msra.mxu3 %v979_v9  ;;  %v960_v6 = vld [vmem:[%s1399_s0 + $0xc4] sm:$0xf]  ;;  %v844_v7 = vld [vmem:[%s1399_s0 + $0xc8] sm:$0xf0]  ;;  %v843_v9 = vor.u32 %v961_v3, %v842_v2  ;;  %v946_v16 = vld [vmem:[%s1399_s0 + $0x54] sm:$0xf] }
  0x14   :  { %v788_v17 = vld [vmem:[%s1399_s0 + $0x58] sm:$0xf0]  ;;  %v962_v18 = vld [vmem:[%s1399_s0 + $0xd4] sm:$0xf]  ;;  %v948_v28 = vld [vmem:[%s1399_s0 + $0x64] sm:$0xf] }
  0x15   :  { %v852_v19 = vld [vmem:[%s1399_s0 + $0xd8] sm:$0xf0]  ;;  %v791_v22 = vor.u32 %v946_v16, %v788_v17  ;;  %v796_v29 = vld [vmem:[%s1399_s0 + $0x68] sm:$0xf0]  ;;  %v964_v30 = vld [vmem:[%s1399_s0 + $0xe4] sm:$0xf] }
  0x16   :  { %404 = vmatpush.bf16.msra.mxu0 %v970_v10  ;;  %1084 = vmatpush.bf16.msra.mxu2 %v970_v10  ;;  %v783_v10 = vor.u32 %v944_v4, %v780_v5  ;;  %v855_v23 = vor.u32 %v962_v18, %v852_v19  ;;  %v860_v31 = vld [vmem:[%s1399_s0 + $0xe8] sm:$0xf0]  ;;  %v799_v34 = vor.u32 %v948_v28, %v796_v29  ;;  %v950_v40 = vld [vmem:[%s1399_s0 + $0x74] sm:$0xf]  ;;  %v804_v41 = vld [vmem:[%s1399_s0 + $0x78] sm:$0xf0] }
  0x17   :  { %493 = vmatpush.bf16.msra.mxu1 %v978_v11  ;;  %1092 = vmatpush.bf16.msra.mxu3 %v978_v11  ;;  %v847_v11 = vor.u32 %v960_v6, %v844_v7  ;;  %v863_v35 = vor.u32 %v964_v30, %v860_v31  ;;  %v966_v42 = vld [vmem:[%s1399_s0 + $0xf4] sm:$0xf]  ;;  %v868_v43 = vld [vmem:[%s1399_s0 + $0xf8] sm:$0xf0]  ;;  %v807_v46 = vor.u32 %v950_v40, %v804_v41 }
  0x18   :  { %v871_v47 = vor.u32 %v966_v42, %v868_v43 }
  0x1a   :  { %405 = vmatpush.bf16.msra.mxu0 %v969_v12  ;;  %1085 = vmatpush.bf16.msra.mxu2 %v969_v12  ;;  %v786_v12 = vld [vmem:[%s1399_s0 + $0x50] sm:$0xf] }
  0x1b   :  { %494 = vmatpush.bf16.msra.mxu1 %v977_v13  ;;  %1093 = vmatpush.bf16.msra.mxu3 %v977_v13  ;;  %v947_v13 = vld [vmem:[%s1399_s0 + $0x54] sm:$0xf0] }
  0x1c   :  { %v787_v20 = vor.u32 %v947_v13, %v786_v12 }
  0x1e   :  { %406 = vmatpush.bf16.msra.mxu0 %v968_v14  ;;  %1086 = vmatpush.bf16.msra.mxu2 %v968_v14  ;;  %v850_v14 = vld [vmem:[%s1399_s0 + $0xd0] sm:$0xf] }
  0x1f   :  { %495 = vmatpush.bf16.msra.mxu1 %v976_v15  ;;  %1094 = vmatpush.bf16.msra.mxu3 %v976_v15  ;;  %v963_v15 = vld [vmem:[%s1399_s0 + $0xd4] sm:$0xf0] }
  0x20   :  { %v851_v21 = vor.u32 %v963_v15, %v850_v14 }
  0x21   :  { %407 = vmatmul.bf16.vlgmr.msra.gmra.mxu0 %v747_v24  ;;  %447 = vmatmul.bf16.vlgmr.msra.gmra.mxu2 %v811_v25  ;;  %v794_v24 = vld [vmem:[%s1399_s0 + $0x60] sm:$0xf]  ;;  %v949_v25 = vld [vmem:[%s1399_s0 + $0x64] sm:$0xf0] }
  0x22   :  { %496 = vmatmul.bf16.vlgmr.msra.gmra.mxu1 %v751_v26  ;;  %536 = vmatmul.bf16.vlgmr.msra.gmra.mxu3 %v815_v27  ;;  %v858_v26 = vld [vmem:[%s1399_s0 + $0xe0] sm:$0xf]  ;;  %v965_v27 = vld [vmem:[%s1399_s0 + $0xe4] sm:$0xf0]  ;;  %v795_v32 = vor.u32 %v949_v25, %v794_v24 }
  0x23   :  { %v859_v33 = vor.u32 %v965_v27, %v858_v26 }
  0x31   :  { %412 = vmatmul.bf16.gmra.mxu0 %v755_v36  ;;  %452 = vmatmul.bf16.gmra.mxu2 %v819_v37  ;;  %v802_v36 = vld [vmem:[%s1399_s0 + $0x70] sm:$0xf]  ;;  %v951_v37 = vld [vmem:[%s1399_s0 + $0x74] sm:$0xf0] }
  0x32   :  { %501 = vmatmul.bf16.gmra.mxu1 %v759_v38  ;;  %541 = vmatmul.bf16.gmra.mxu3 %v823_v39  ;;  %v866_v38 = vld [vmem:[%s1399_s0 + $0xf0] sm:$0xf]  ;;  %v967_v39 = vld [vmem:[%s1399_s0 + $0xf4] sm:$0xf0]  ;;  %v803_v44 = vor.u32 %v951_v37, %v802_v36 }
  0x33   :  { %v867_v45 = vor.u32 %v967_v39, %v866_v38 }
  0x41   :  { %417 = vmatmul.bf16.gmra.mxu0 %v763_v48  ;;  %457 = vmatmul.bf16.gmra.mxu2 %v827_v49 }
  0x42   :  { %506 = vmatmul.bf16.gmra.mxu1 %v767_v50  ;;  %546 = vmatmul.bf16.gmra.mxu3 %v831_v51 }
  0x51   :  { %422 = vmatmul.bf16.gmra.mxu0 %v771_v60  ;;  %462 = vmatmul.bf16.gmra.mxu2 %v835_v61 }
  0x52   :  { %511 = vmatmul.bf16.gmra.mxu1 %v775_v62  ;;  %551 = vmatmul.bf16.gmra.mxu3 %v839_v63 }
  0x61   :  { %427 = vmatmul.bf16.gmra.mxu0 %v779_v8  ;;  %467 = vmatmul.bf16.gmra.mxu2 %v843_v9 }
  0x62   :  { %516 = vmatmul.bf16.gmra.mxu1 %v783_v10  ;;  %556 = vmatmul.bf16.gmra.mxu3 %v847_v11 }
  0x71   :  { %432 = vmatmul.bf16.gmra.mxu0 %v787_v20  ;;  %472 = vmatmul.bf16.gmra.mxu2 %v851_v21 }
  0x72   :  { %521 = vmatmul.bf16.gmra.mxu1 %v791_v22  ;;  %561 = vmatmul.bf16.gmra.mxu3 %v855_v23 }
  0x81   :  { %437 = vmatmul.bf16.gmra.mxu0 %v795_v32  ;;  %477 = vmatmul.bf16.gmra.mxu2 %v859_v33 }
  0x82   :  { %526 = vmatmul.bf16.gmra.mxu1 %v799_v34  ;;  %566 = vmatmul.bf16.gmra.mxu3 %v863_v35 }
  0x91   :  { %442 = vmatmul.bf16.gmra.mxu0 %v803_v44  ;;  %482 = vmatmul.bf16.gmra.mxu2 %v867_v45 }
  0x92   :  { %531 = vmatmul.bf16.gmra.mxu1 %v807_v46  ;;  %571 = vmatmul.bf16.gmra.mxu3 %v871_v47 }
  0x9e   :  { %v408_v48 = vpop.f32.mrf.mxu0 }
  0x9f   :  { %v497_v49 = vpop.f32.mrf.mxu1 }
  0xa0   :  { %v498_v54 = vadd.f32 %v497_v49, %v408_v48 }
  0xa4   :  { %v448_v50 = vpop.f32.mrf.mxu2 }
  0xa5   :  { %v537_v51 = vpop.f32.mrf.mxu3 }
  0xa6   :  { %v410_v52 = vpop.f32.mrf.mxu0  ;;  %v538_v59 = vadd.f32 %v537_v51, %v448_v50 }
  0xa7   :  { %v499_v53 = vpop.f32.mrf.mxu1 }
  0xa8   :  { %v500_v55 = vadd.f32 %v499_v53, %v410_v52 }
  0xaa   :  { %v987_v56 = vpack.c.bf16 %v500_v55, %v498_v54 }
  0xac   :  { %988 = vst [vmem:[%s1400_s2] sm:$0xff] %v987_v56   ;;  %v450_v57 = vpop.f32.mrf.mxu2 }
  0xad   :  { %v539_v58 = vpop.f32.mrf.mxu3 }
  0xae   :  { %v540_v60 = vadd.f32 %v539_v58, %v450_v57  ;;  %v413_v61 = vpop.f32.mrf.mxu0 }
  0xaf   :  { %v502_v62 = vpop.f32.mrf.mxu1 }
  0xb0   :  { %v1027_v63 = vpack.c.bf16 %v540_v60, %v538_v59  ;;  %v503_v4 = vadd.f32 %v502_v62, %v413_v61 }
  0xb2   :  { %1071 = vst [vmem:[%s1400_s2 + $0x40] sm:$0xff] %v1027_v63  }
  0xb4   :  { %v453_v0 = vpop.f32.mrf.mxu2 }
  0xb5   :  { %v542_v1 = vpop.f32.mrf.mxu3 }
  0xb6   :  { %v415_v2 = vpop.f32.mrf.mxu0  ;;  %v543_v9 = vadd.f32 %v542_v1, %v453_v0 }
  0xb7   :  { %v504_v3 = vpop.f32.mrf.mxu1 }
  0xb8   :  { %v505_v5 = vadd.f32 %v504_v3, %v415_v2 }
  0xba   :  { %v992_v6 = vpack.c.bf16 %v505_v5, %v503_v4 }
  0xbc   :  { %1064 = vst [vmem:[%s1400_s2 + $0x8] sm:$0xff] %v992_v6   ;;  %v455_v7 = vpop.f32.mrf.mxu2 }
  0xbd   :  { %v544_v8 = vpop.f32.mrf.mxu3 }
  0xbe   :  { %v545_v10 = vadd.f32 %v544_v8, %v455_v7  ;;  %v418_v11 = vpop.f32.mrf.mxu0 }
  0xbf   :  { %v507_v12 = vpop.f32.mrf.mxu1 }
  0xc0   :  { %v1032_v13 = vpack.c.bf16 %v545_v10, %v543_v9  ;;  %v508_v18 = vadd.f32 %v507_v12, %v418_v11 }
  0xc2   :  { %1072 = vst [vmem:[%s1400_s2 + $0x48] sm:$0xff] %v1032_v13  }
  0xc4   :  { %v458_v14 = vpop.f32.mrf.mxu2 }
  0xc5   :  { %v547_v15 = vpop.f32.mrf.mxu3 }
  0xc6   :  { %v420_v16 = vpop.f32.mrf.mxu0  ;;  %v548_v23 = vadd.f32 %v547_v15, %v458_v14 }
  0xc7   :  { %v509_v17 = vpop.f32.mrf.mxu1 }
  0xc8   :  { %v510_v19 = vadd.f32 %v509_v17, %v420_v16 }
  0xca   :  { %v997_v20 = vpack.c.bf16 %v510_v19, %v508_v18 }
  0xcc   :  { %1065 = vst [vmem:[%s1400_s2 + $0x10] sm:$0xff] %v997_v20   ;;  %v460_v21 = vpop.f32.mrf.mxu2 }
  0xcd   :  { %v549_v22 = vpop.f32.mrf.mxu3 }
  0xce   :  { %v550_v24 = vadd.f32 %v549_v22, %v460_v21  ;;  %v423_v25 = vpop.f32.mrf.mxu0 }
  0xcf   :  { %v512_v26 = vpop.f32.mrf.mxu1 }
  0xd0   :  { %v1037_v27 = vpack.c.bf16 %v550_v24, %v548_v23  ;;  %v513_v32 = vadd.f32 %v512_v26, %v423_v25 }
  0xd2   :  { %1073 = vst [vmem:[%s1400_s2 + $0x50] sm:$0xff] %v1037_v27  }
  0xd4   :  { %v463_v28 = vpop.f32.mrf.mxu2 }
  0xd5   :  { %v552_v29 = vpop.f32.mrf.mxu3 }
  0xd6   :  { %v425_v30 = vpop.f32.mrf.mxu0  ;;  %v553_v37 = vadd.f32 %v552_v29, %v463_v28 }
  0xd7   :  { %v514_v31 = vpop.f32.mrf.mxu1 }
  0xd8   :  { %v515_v33 = vadd.f32 %v514_v31, %v425_v30 }
  0xda   :  { %v1002_v34 = vpack.c.bf16 %v515_v33, %v513_v32 }
  0xdc   :  { %1066 = vst [vmem:[%s1400_s2 + $0x18] sm:$0xff] %v1002_v34   ;;  %v465_v35 = vpop.f32.mrf.mxu2 }
  0xdd   :  { %v554_v36 = vpop.f32.mrf.mxu3 }
  0xde   :  { %v555_v38 = vadd.f32 %v554_v36, %v465_v35  ;;  %v428_v39 = vpop.f32.mrf.mxu0 }
  0xdf   :  { %v517_v40 = vpop.f32.mrf.mxu1 }
  0xe0   :  { %v1042_v41 = vpack.c.bf16 %v555_v38, %v553_v37  ;;  %v518_v46 = vadd.f32 %v517_v40, %v428_v39 }
  0xe2   :  { %1074 = vst [vmem:[%s1400_s2 + $0x58] sm:$0xff] %v1042_v41  }
  0xe4   :  { %v468_v42 = vpop.f32.mrf.mxu2 }
  0xe5   :  { %v557_v43 = vpop.f32.mrf.mxu3 }
  0xe6   :  { %v430_v44 = vpop.f32.mrf.mxu0  ;;  %v558_v51 = vadd.f32 %v557_v43, %v468_v42 }
  0xe7   :  { %v519_v45 = vpop.f32.mrf.mxu1 }
  0xe8   :  { %v520_v47 = vadd.f32 %v519_v45, %v430_v44 }
  0xea   :  { %v1007_v48 = vpack.c.bf16 %v520_v47, %v518_v46 }
  0xec   :  { %1067 = vst [vmem:[%s1400_s2 + $0x20] sm:$0xff] %v1007_v48   ;;  %v470_v49 = vpop.f32.mrf.mxu2 }
  0xed   :  { %v559_v50 = vpop.f32.mrf.mxu3 }
  0xee   :  { %v560_v52 = vadd.f32 %v559_v50, %v470_v49  ;;  %v433_v53 = vpop.f32.mrf.mxu0 }
  0xef   :  { %v522_v54 = vpop.f32.mrf.mxu1 }
  0xf0   :  { %v1047_v55 = vpack.c.bf16 %v560_v52, %v558_v51  ;;  %v523_v60 = vadd.f32 %v522_v54, %v433_v53 }
  0xf2   :  { %1075 = vst [vmem:[%s1400_s2 + $0x60] sm:$0xff] %v1047_v55  }
  0xf4   :  { %v473_v56 = vpop.f32.mrf.mxu2 }
  0xf5   :  { %v562_v57 = vpop.f32.mrf.mxu3 }
  0xf6   :  { %v435_v58 = vpop.f32.mrf.mxu0  ;;  %v563_v1 = vadd.f32 %v562_v57, %v473_v56 }
  0xf7   :  { %v524_v59 = vpop.f32.mrf.mxu1 }
  0xf8   :  { %v525_v61 = vadd.f32 %v524_v59, %v435_v58 }
  0xfa   :  { %v1012_v62 = vpack.c.bf16 %v525_v61, %v523_v60 }
  0xfc   :  { %1068 = vst [vmem:[%s1400_s2 + $0x28] sm:$0xff] %v1012_v62   ;;  %v475_v63 = vpop.f32.mrf.mxu2 }
  0xfd   :  { %v564_v0 = vpop.f32.mrf.mxu3 }
  0xfe   :  { %v565_v2 = vadd.f32 %v564_v0, %v475_v63  ;;  %v438_v3 = vpop.f32.mrf.mxu0 }
  0xff   :  { %v527_v4 = vpop.f32.mrf.mxu1 }
 0x100   :  { %v1052_v5 = vpack.c.bf16 %v565_v2, %v563_v1  ;;  %v528_v10 = vadd.f32 %v527_v4, %v438_v3 }
 0x102   :  { %1076 = vst [vmem:[%s1400_s2 + $0x68] sm:$0xff] %v1052_v5  }
 0x104   :  { %v478_v6 = vpop.f32.mrf.mxu2 }
 0x105   :  { %v567_v7 = vpop.f32.mrf.mxu3 }
 0x106   :  { %v440_v8 = vpop.f32.mrf.mxu0  ;;  %v568_v15 = vadd.f32 %v567_v7, %v478_v6 }
 0x107   :  { %v529_v9 = vpop.f32.mrf.mxu1 }
 0x108   :  { %v530_v11 = vadd.f32 %v529_v9, %v440_v8 }
 0x10a   :  { %v1017_v12 = vpack.c.bf16 %v530_v11, %v528_v10 }
 0x10c   :  { %1069 = vst [vmem:[%s1400_s2 + $0x30] sm:$0xff] %v1017_v12   ;;  %v480_v13 = vpop.f32.mrf.mxu2 }
 0x10d   :  { %v569_v14 = vpop.f32.mrf.mxu3 }
 0x10e   :  { %v570_v16 = vadd.f32 %v569_v14, %v480_v13  ;;  %v443_v17 = vpop.f32.mrf.mxu0 }
 0x10f   :  { %v532_v18 = vpop.f32.mrf.mxu1 }
 0x110   :  { %v1057_v19 = vpack.c.bf16 %v570_v16, %v568_v15  ;;  %v533_v24 = vadd.f32 %v532_v18, %v443_v17 }
 0x112   :  { %1077 = vst [vmem:[%s1400_s2 + $0x70] sm:$0xff] %v1057_v19  }
 0x114   :  { %v483_v20 = vpop.f32.mrf.mxu2 }
 0x115   :  { %v572_v21 = vpop.f32.mrf.mxu3 }
 0x116   :  { %v445_v22 = vpop.f32.mrf.mxu0  ;;  %v573_v29 = vadd.f32 %v572_v21, %v483_v20 }
 0x117   :  { %v534_v23 = vpop.f32.mrf.mxu1 }
 0x118   :  { %v535_v25 = vadd.f32 %v534_v23, %v445_v22 }
 0x11a   :  { %v1022_v26 = vpack.c.bf16 %v535_v25, %v533_v24 }
 0x11c   :  { %1070 = vst [vmem:[%s1400_s2 + $0x38] sm:$0xff] %v1022_v26   ;;  %v485_v27 = vpop.f32.mrf.mxu2 }
 0x11d   :  { %v574_v28 = vpop.f32.mrf.mxu3 }
 0x11e   :  { %v575_v30 = vadd.f32 %v574_v28, %v485_v27 }
 0x120   :  { %v1062_v31 = vpack.c.bf16 %v575_v30, %v573_v29 }
 0x122   :  { %1078 = vst [vmem:[%s1400_s2 + $0x78] sm:$0xff] %v1062_v31  }

// kernel: att_gcn.3
= control target key start
LH: loop header
LB: loop body
LE: loop exit
PB: predicated region body
PF: predicated region fallthrough
CT: control target
= control target key end

     0   :  { %s1319_s1 = inlined_call_operand.vmem [shape: bf16[256,128], index: 1, kind: input, shape index: {}]   ;;  %s1320_s0 = inlined_call_operand.vmem [shape: bf16[256,256], index: 0, kind: input, shape index: {}]   ;;  %s1321_s2 = inlined_call_operand.vmem [shape: f32[256,128], index: 2, kind: output, shape index: {}]  }
   0x1   :  { %v943_v0 = vld [vmem:[%s1319_s1 + $0x38] sm:$0xff]  ;;  %v942_v2 = vld [vmem:[%s1319_s1 + $0x30] sm:$0xff]  ;;  %v941_v4 = vld [vmem:[%s1319_s1 + $0x28] sm:$0xff] }
   0x2   :  { %v951_v1 = vld [vmem:[%s1319_s1 + $0x78] sm:$0xff]  ;;  %399 = vmatpush.bf16.msra.mxu0 %v943_v0  ;;  %952 = vmatpush.bf16.msra.mxu2 %v943_v0  ;;  %v950_v3 = vld [vmem:[%s1319_s1 + $0x70] sm:$0xff]  ;;  %v949_v5 = vld [vmem:[%s1319_s1 + $0x68] sm:$0xff] }
   0x3   :  { %488 = vmatpush.bf16.msra.mxu1 %v951_v1  ;;  %960 = vmatpush.bf16.msra.mxu3 %v951_v1  ;;  %v940_v6 = vld [vmem:[%s1319_s1 + $0x20] sm:$0xff]  ;;  %v939_v8 = vld [vmem:[%s1319_s1 + $0x18] sm:$0xff]  ;;  %v938_v10 = vld [vmem:[%s1319_s1 + $0x10] sm:$0xff] }
   0x4   :  { %v948_v7 = vld [vmem:[%s1319_s1 + $0x60] sm:$0xff]  ;;  %v947_v9 = vld [vmem:[%s1319_s1 + $0x58] sm:$0xff]  ;;  %v946_v11 = vld [vmem:[%s1319_s1 + $0x50] sm:$0xff] }
   0x5   :  { %v937_v12 = vld [vmem:[%s1319_s1 + $0x8] sm:$0xff]  ;;  %v936_v14 = vld [vmem:[%s1319_s1] sm:$0xff]  ;;  %v722_v28 = vld [vmem:[%s1320_s0 + $0x10] sm:$0xf] }
   0x6   :  { %400 = vmatpush.bf16.msra.mxu0 %v942_v2  ;;  %953 = vmatpush.bf16.msra.mxu2 %v942_v2  ;;  %v945_v13 = vld [vmem:[%s1319_s1 + $0x48] sm:$0xff]  ;;  %v944_v15 = vld [vmem:[%s1319_s1 + $0x40] sm:$0xff]  ;;  %v907_v29 = vld [vmem:[%s1320_s0 + $0x14] sm:$0xf0] }
   0x7   :  { %489 = vmatpush.bf16.msra.mxu1 %v950_v3  ;;  %961 = vmatpush.bf16.msra.mxu3 %v950_v3  ;;  %v714_v16 = vld [vmem:[%s1320_s0] sm:$0xf]  ;;  %v905_v17 = vld [vmem:[%s1320_s0 + $0x4] sm:$0xf0]  ;;  %v904_v20 = vld [vmem:[%s1320_s0 + $0x4] sm:$0xf]  ;;  %v723_v36 = vor.u32 %v907_v29, %v722_v28 }
   0x8   :  { %v778_v18 = vld [vmem:[%s1320_s0 + $0x80] sm:$0xf]  ;;  %v921_v19 = vld [vmem:[%s1320_s0 + $0x84] sm:$0xf0]  ;;  %v716_v21 = vld [vmem:[%s1320_s0 + $0x8] sm:$0xf0]  ;;  %v715_v24 = vor.u32 %v905_v17, %v714_v16 }
   0x9   :  { %v920_v22 = vld [vmem:[%s1320_s0 + $0x84] sm:$0xf]  ;;  %v780_v23 = vld [vmem:[%s1320_s0 + $0x88] sm:$0xf0]  ;;  %v779_v25 = vor.u32 %v921_v19, %v778_v18  ;;  %v719_v26 = vor.u32 %v904_v20, %v716_v21  ;;  %v786_v30 = vld [vmem:[%s1320_s0 + $0x90] sm:$0xf] }
   0xa   :  { %401 = vmatpush.bf16.msra.mxu0 %v941_v4  ;;  %954 = vmatpush.bf16.msra.mxu2 %v941_v4  ;;  %v783_v27 = vor.u32 %v920_v22, %v780_v23  ;;  %v923_v31 = vld [vmem:[%s1320_s0 + $0x94] sm:$0xf0]  ;;  %v906_v32 = vld [vmem:[%s1320_s0 + $0x14] sm:$0xf]  ;;  %v724_v33 = vld [vmem:[%s1320_s0 + $0x18] sm:$0xf0] }
   0xb   :  { %490 = vmatpush.bf16.msra.mxu1 %v949_v5  ;;  %962 = vmatpush.bf16.msra.mxu3 %v949_v5  ;;  %v922_v34 = vld [vmem:[%s1320_s0 + $0x94] sm:$0xf]  ;;  %v788_v35 = vld [vmem:[%s1320_s0 + $0x98] sm:$0xf0]  ;;  %v787_v37 = vor.u32 %v923_v31, %v786_v30  ;;  %v727_v38 = vor.u32 %v906_v32, %v724_v33  ;;  %v730_v40 = vld [vmem:[%s1320_s0 + $0x20] sm:$0xf] }
   0xc   :  { %v791_v39 = vor.u32 %v922_v34, %v788_v35  ;;  %v909_v41 = vld [vmem:[%s1320_s0 + $0x24] sm:$0xf0]  ;;  %v794_v42 = vld [vmem:[%s1320_s0 + $0xa0] sm:$0xf]  ;;  %v908_v44 = vld [vmem:[%s1320_s0 + $0x24] sm:$0xf] }
   0xd   :  { %v925_v43 = vld [vmem:[%s1320_s0 + $0xa4] sm:$0xf0]  ;;  %v732_v45 = vld [vmem:[%s1320_s0 + $0x28] sm:$0xf0]  ;;  %v924_v46 = vld [vmem:[%s1320_s0 + $0xa4] sm:$0xf]  ;;  %v731_v48 = vor.u32 %v909_v41, %v730_v40 }
   0xe   :  { %402 = vmatpush.bf16.msra.mxu0 %v940_v6  ;;  %955 = vmatpush.bf16.msra.mxu2 %v940_v6  ;;  %v796_v47 = vld [vmem:[%s1320_s0 + $0xa8] sm:$0xf0]  ;;  %v795_v49 = vor.u32 %v925_v43, %v794_v42  ;;  %v735_v50 = vor.u32 %v908_v44, %v732_v45  ;;  %v738_v52 = vld [vmem:[%s1320_s0 + $0x30] sm:$0xf]  ;;  %v911_v53 = vld [vmem:[%s1320_s0 + $0x34] sm:$0xf0] }
   0xf   :  { %491 = vmatpush.bf16.msra.mxu1 %v948_v7  ;;  %963 = vmatpush.bf16.msra.mxu3 %v948_v7  ;;  %v799_v51 = vor.u32 %v924_v46, %v796_v47  ;;  %v802_v54 = vld [vmem:[%s1320_s0 + $0xb0] sm:$0xf]  ;;  %v927_v55 = vld [vmem:[%s1320_s0 + $0xb4] sm:$0xf0]  ;;  %v910_v56 = vld [vmem:[%s1320_s0 + $0x34] sm:$0xf]  ;;  %v739_v60 = vor.u32 %v911_v53, %v738_v52 }
  0x10   :  { %v740_v57 = vld [vmem:[%s1320_s0 + $0x38] sm:$0xf0]  ;;  %v926_v58 = vld [vmem:[%s1320_s0 + $0xb4] sm:$0xf]  ;;  %v803_v61 = vor.u32 %v927_v55, %v802_v54  ;;  %v746_v0 = vld [vmem:[%s1320_s0 + $0x40] sm:$0xf] }
  0x11   :  { %v804_v59 = vld [vmem:[%s1320_s0 + $0xb8] sm:$0xf0]  ;;  %v743_v62 = vor.u32 %v910_v56, %v740_v57  ;;  %v913_v1 = vld [vmem:[%s1320_s0 + $0x44] sm:$0xf0]  ;;  %v810_v2 = vld [vmem:[%s1320_s0 + $0xc0] sm:$0xf] }
  0x12   :  { %403 = vmatpush.bf16.msra.mxu0 %v939_v8  ;;  %956 = vmatpush.bf16.msra.mxu2 %v939_v8  ;;  %v807_v63 = vor.u32 %v926_v58, %v804_v59  ;;  %v929_v3 = vld [vmem:[%s1320_s0 + $0xc4] sm:$0xf0]  ;;  %v912_v4 = vld [vmem:[%s1320_s0 + $0x44] sm:$0xf]  ;;  %v748_v5 = vld [vmem:[%s1320_s0 + $0x48] sm:$0xf0]  ;;  %v747_v8 = vor.u32 %v913_v1, %v746_v0 }
  0x13   :  { %492 = vmatpush.bf16.msra.mxu1 %v947_v9  ;;  %964 = vmatpush.bf16.msra.mxu3 %v947_v9  ;;  %v928_v6 = vld [vmem:[%s1320_s0 + $0xc4] sm:$0xf]  ;;  %v812_v7 = vld [vmem:[%s1320_s0 + $0xc8] sm:$0xf0]  ;;  %v811_v9 = vor.u32 %v929_v3, %v810_v2  ;;  %v914_v16 = vld [vmem:[%s1320_s0 + $0x54] sm:$0xf] }
  0x14   :  { %v756_v17 = vld [vmem:[%s1320_s0 + $0x58] sm:$0xf0]  ;;  %v930_v18 = vld [vmem:[%s1320_s0 + $0xd4] sm:$0xf]  ;;  %v916_v28 = vld [vmem:[%s1320_s0 + $0x64] sm:$0xf] }
  0x15   :  { %v820_v19 = vld [vmem:[%s1320_s0 + $0xd8] sm:$0xf0]  ;;  %v759_v22 = vor.u32 %v914_v16, %v756_v17  ;;  %v764_v29 = vld [vmem:[%s1320_s0 + $0x68] sm:$0xf0]  ;;  %v932_v30 = vld [vmem:[%s1320_s0 + $0xe4] sm:$0xf] }
  0x16   :  { %404 = vmatpush.bf16.msra.mxu0 %v938_v10  ;;  %957 = vmatpush.bf16.msra.mxu2 %v938_v10  ;;  %v751_v10 = vor.u32 %v912_v4, %v748_v5  ;;  %v823_v23 = vor.u32 %v930_v18, %v820_v19  ;;  %v828_v31 = vld [vmem:[%s1320_s0 + $0xe8] sm:$0xf0]  ;;  %v767_v34 = vor.u32 %v916_v28, %v764_v29  ;;  %v918_v40 = vld [vmem:[%s1320_s0 + $0x74] sm:$0xf]  ;;  %v772_v41 = vld [vmem:[%s1320_s0 + $0x78] sm:$0xf0] }
  0x17   :  { %493 = vmatpush.bf16.msra.mxu1 %v946_v11  ;;  %965 = vmatpush.bf16.msra.mxu3 %v946_v11  ;;  %v815_v11 = vor.u32 %v928_v6, %v812_v7  ;;  %v831_v35 = vor.u32 %v932_v30, %v828_v31  ;;  %v934_v42 = vld [vmem:[%s1320_s0 + $0xf4] sm:$0xf]  ;;  %v836_v43 = vld [vmem:[%s1320_s0 + $0xf8] sm:$0xf0]  ;;  %v775_v46 = vor.u32 %v918_v40, %v772_v41 }
  0x18   :  { %v839_v47 = vor.u32 %v934_v42, %v836_v43 }
  0x1a   :  { %405 = vmatpush.bf16.msra.mxu0 %v937_v12  ;;  %958 = vmatpush.bf16.msra.mxu2 %v937_v12  ;;  %v754_v12 = vld [vmem:[%s1320_s0 + $0x50] sm:$0xf] }
  0x1b   :  { %494 = vmatpush.bf16.msra.mxu1 %v945_v13  ;;  %966 = vmatpush.bf16.msra.mxu3 %v945_v13  ;;  %v915_v13 = vld [vmem:[%s1320_s0 + $0x54] sm:$0xf0] }
  0x1c   :  { %v755_v20 = vor.u32 %v915_v13, %v754_v12 }
  0x1e   :  { %406 = vmatpush.bf16.msra.mxu0 %v936_v14  ;;  %959 = vmatpush.bf16.msra.mxu2 %v936_v14  ;;  %v818_v14 = vld [vmem:[%s1320_s0 + $0xd0] sm:$0xf] }
  0x1f   :  { %495 = vmatpush.bf16.msra.mxu1 %v944_v15  ;;  %967 = vmatpush.bf16.msra.mxu3 %v944_v15  ;;  %v931_v15 = vld [vmem:[%s1320_s0 + $0xd4] sm:$0xf0] }
  0x20   :  { %v819_v21 = vor.u32 %v931_v15, %v818_v14 }
  0x21   :  { %407 = vmatmul.bf16.vlgmr.msra.gmra.mxu0 %v715_v24  ;;  %447 = vmatmul.bf16.vlgmr.msra.gmra.mxu2 %v779_v25  ;;  %v762_v24 = vld [vmem:[%s1320_s0 + $0x60] sm:$0xf]  ;;  %v917_v25 = vld [vmem:[%s1320_s0 + $0x64] sm:$0xf0] }
  0x22   :  { %496 = vmatmul.bf16.vlgmr.msra.gmra.mxu1 %v719_v26  ;;  %536 = vmatmul.bf16.vlgmr.msra.gmra.mxu3 %v783_v27  ;;  %v826_v26 = vld [vmem:[%s1320_s0 + $0xe0] sm:$0xf]  ;;  %v933_v27 = vld [vmem:[%s1320_s0 + $0xe4] sm:$0xf0]  ;;  %v763_v32 = vor.u32 %v917_v25, %v762_v24 }
  0x23   :  { %v827_v33 = vor.u32 %v933_v27, %v826_v26 }
  0x31   :  { %412 = vmatmul.bf16.gmra.mxu0 %v723_v36  ;;  %452 = vmatmul.bf16.gmra.mxu2 %v787_v37  ;;  %v770_v36 = vld [vmem:[%s1320_s0 + $0x70] sm:$0xf]  ;;  %v919_v37 = vld [vmem:[%s1320_s0 + $0x74] sm:$0xf0] }
  0x32   :  { %501 = vmatmul.bf16.gmra.mxu1 %v727_v38  ;;  %541 = vmatmul.bf16.gmra.mxu3 %v791_v39  ;;  %v834_v38 = vld [vmem:[%s1320_s0 + $0xf0] sm:$0xf]  ;;  %v935_v39 = vld [vmem:[%s1320_s0 + $0xf4] sm:$0xf0]  ;;  %v771_v44 = vor.u32 %v919_v37, %v770_v36 }
  0x33   :  { %v835_v45 = vor.u32 %v935_v39, %v834_v38 }
  0x41   :  { %417 = vmatmul.bf16.gmra.mxu0 %v731_v48  ;;  %457 = vmatmul.bf16.gmra.mxu2 %v795_v49 }
  0x42   :  { %506 = vmatmul.bf16.gmra.mxu1 %v735_v50  ;;  %546 = vmatmul.bf16.gmra.mxu3 %v799_v51 }
  0x51   :  { %422 = vmatmul.bf16.gmra.mxu0 %v739_v60  ;;  %462 = vmatmul.bf16.gmra.mxu2 %v803_v61 }
  0x52   :  { %511 = vmatmul.bf16.gmra.mxu1 %v743_v62  ;;  %551 = vmatmul.bf16.gmra.mxu3 %v807_v63 }
  0x61   :  { %427 = vmatmul.bf16.gmra.mxu0 %v747_v8  ;;  %467 = vmatmul.bf16.gmra.mxu2 %v811_v9 }
  0x62   :  { %516 = vmatmul.bf16.gmra.mxu1 %v751_v10  ;;  %556 = vmatmul.bf16.gmra.mxu3 %v815_v11 }
  0x71   :  { %432 = vmatmul.bf16.gmra.mxu0 %v755_v20  ;;  %472 = vmatmul.bf16.gmra.mxu2 %v819_v21 }
  0x72   :  { %521 = vmatmul.bf16.gmra.mxu1 %v759_v22  ;;  %561 = vmatmul.bf16.gmra.mxu3 %v823_v23 }
  0x81   :  { %437 = vmatmul.bf16.gmra.mxu0 %v763_v32  ;;  %477 = vmatmul.bf16.gmra.mxu2 %v827_v33 }
  0x82   :  { %526 = vmatmul.bf16.gmra.mxu1 %v767_v34  ;;  %566 = vmatmul.bf16.gmra.mxu3 %v831_v35 }
  0x91   :  { %442 = vmatmul.bf16.gmra.mxu0 %v771_v44  ;;  %482 = vmatmul.bf16.gmra.mxu2 %v835_v45 }
  0x92   :  { %531 = vmatmul.bf16.gmra.mxu1 %v775_v46  ;;  %571 = vmatmul.bf16.gmra.mxu3 %v839_v47 }
  0x9e   :  { %v408_v48 = vpop.f32.mrf.mxu0 }
  0x9f   :  { %v497_v49 = vpop.f32.mrf.mxu1 }
  0xa0   :  { %v498_v50 = vadd.f32 %v497_v49, %v408_v48 }
  0xa2   :  { %676 = vst [vmem:[%s1321_s2] sm:$0xff] %v498_v50 }
  0xa4   :  { %v448_v51 = vpop.f32.mrf.mxu2 }
  0xa5   :  { %v537_v52 = vpop.f32.mrf.mxu3 }
  0xa6   :  { %v538_v53 = vadd.f32 %v537_v52, %v448_v51  ;;  %v410_v54 = vpop.f32.mrf.mxu0 }
  0xa7   :  { %v499_v55 = vpop.f32.mrf.mxu1 }
  0xa8   :  { %692 = vst [vmem:[%s1321_s2 + $0x80] sm:$0xff] %v538_v53  ;;  %v500_v56 = vadd.f32 %v499_v55, %v410_v54 }
  0xaa   :  { %677 = vst [vmem:[%s1321_s2 + $0x8] sm:$0xff] %v500_v56 }
  0xac   :  { %v450_v57 = vpop.f32.mrf.mxu2 }
  0xad   :  { %v539_v58 = vpop.f32.mrf.mxu3 }
  0xae   :  { %v540_v59 = vadd.f32 %v539_v58, %v450_v57  ;;  %v413_v60 = vpop.f32.mrf.mxu0 }
  0xaf   :  { %v502_v61 = vpop.f32.mrf.mxu1 }
  0xb0   :  { %693 = vst [vmem:[%s1321_s2 + $0x88] sm:$0xff] %v540_v59  ;;  %v503_v62 = vadd.f32 %v502_v61, %v413_v60 }
  0xb2   :  { %678 = vst [vmem:[%s1321_s2 + $0x10] sm:$0xff] %v503_v62 }
  0xb4   :  { %v453_v63 = vpop.f32.mrf.mxu2 }
  0xb5   :  { %v542_v0 = vpop.f32.mrf.mxu3 }
  0xb6   :  { %v543_v1 = vadd.f32 %v542_v0, %v453_v63  ;;  %v415_v2 = vpop.f32.mrf.mxu0 }
  0xb7   :  { %v504_v3 = vpop.f32.mrf.mxu1 }
  0xb8   :  { %694 = vst [vmem:[%s1321_s2 + $0x90] sm:$0xff] %v543_v1  ;;  %v505_v4 = vadd.f32 %v504_v3, %v415_v2 }
  0xba   :  { %679 = vst [vmem:[%s1321_s2 + $0x18] sm:$0xff] %v505_v4 }
  0xbc   :  { %v455_v5 = vpop.f32.mrf.mxu2 }
  0xbd   :  { %v544_v6 = vpop.f32.mrf.mxu3 }
  0xbe   :  { %v545_v7 = vadd.f32 %v544_v6, %v455_v5  ;;  %v418_v8 = vpop.f32.mrf.mxu0 }
  0xbf   :  { %v507_v9 = vpop.f32.mrf.mxu1 }
  0xc0   :  { %695 = vst [vmem:[%s1321_s2 + $0x98] sm:$0xff] %v545_v7  ;;  %v508_v10 = vadd.f32 %v507_v9, %v418_v8 }
  0xc2   :  { %680 = vst [vmem:[%s1321_s2 + $0x20] sm:$0xff] %v508_v10 }
  0xc4   :  { %v458_v11 = vpop.f32.mrf.mxu2 }
  0xc5   :  { %v547_v12 = vpop.f32.mrf.mxu3 }
  0xc6   :  { %v548_v13 = vadd.f32 %v547_v12, %v458_v11  ;;  %v420_v14 = vpop.f32.mrf.mxu0 }
  0xc7   :  { %v509_v15 = vpop.f32.mrf.mxu1 }
  0xc8   :  { %696 = vst [vmem:[%s1321_s2 + $0xa0] sm:$0xff] %v548_v13  ;;  %v510_v16 = vadd.f32 %v509_v15, %v420_v14 }
  0xca   :  { %681 = vst [vmem:[%s1321_s2 + $0x28] sm:$0xff] %v510_v16 }
  0xcc   :  { %v460_v17 = vpop.f32.mrf.mxu2 }
  0xcd   :  { %v549_v18 = vpop.f32.mrf.mxu3 }
  0xce   :  { %v550_v19 = vadd.f32 %v549_v18, %v460_v17  ;;  %v423_v20 = vpop.f32.mrf.mxu0 }
  0xcf   :  { %v512_v21 = vpop.f32.mrf.mxu1 }
  0xd0   :  { %697 = vst [vmem:[%s1321_s2 + $0xa8] sm:$0xff] %v550_v19  ;;  %v513_v22 = vadd.f32 %v512_v21, %v423_v20 }
  0xd2   :  { %682 = vst [vmem:[%s1321_s2 + $0x30] sm:$0xff] %v513_v22 }
  0xd4   :  { %v463_v23 = vpop.f32.mrf.mxu2 }
  0xd5   :  { %v552_v24 = vpop.f32.mrf.mxu3 }
  0xd6   :  { %v553_v25 = vadd.f32 %v552_v24, %v463_v23  ;;  %v425_v26 = vpop.f32.mrf.mxu0 }
  0xd7   :  { %v514_v27 = vpop.f32.mrf.mxu1 }
  0xd8   :  { %698 = vst [vmem:[%s1321_s2 + $0xb0] sm:$0xff] %v553_v25  ;;  %v515_v28 = vadd.f32 %v514_v27, %v425_v26 }
  0xda   :  { %683 = vst [vmem:[%s1321_s2 + $0x38] sm:$0xff] %v515_v28 }
  0xdc   :  { %v465_v29 = vpop.f32.mrf.mxu2 }
  0xdd   :  { %v554_v30 = vpop.f32.mrf.mxu3 }
  0xde   :  { %v555_v31 = vadd.f32 %v554_v30, %v465_v29  ;;  %v428_v32 = vpop.f32.mrf.mxu0 }
  0xdf   :  { %v517_v33 = vpop.f32.mrf.mxu1 }
  0xe0   :  { %699 = vst [vmem:[%s1321_s2 + $0xb8] sm:$0xff] %v555_v31  ;;  %v518_v34 = vadd.f32 %v517_v33, %v428_v32 }
  0xe2   :  { %684 = vst [vmem:[%s1321_s2 + $0x40] sm:$0xff] %v518_v34 }
  0xe4   :  { %v468_v35 = vpop.f32.mrf.mxu2 }
  0xe5   :  { %v557_v36 = vpop.f32.mrf.mxu3 }
  0xe6   :  { %v558_v37 = vadd.f32 %v557_v36, %v468_v35  ;;  %v430_v38 = vpop.f32.mrf.mxu0 }
  0xe7   :  { %v519_v39 = vpop.f32.mrf.mxu1 }
  0xe8   :  { %700 = vst [vmem:[%s1321_s2 + $0xc0] sm:$0xff] %v558_v37  ;;  %v520_v40 = vadd.f32 %v519_v39, %v430_v38 }
  0xea   :  { %685 = vst [vmem:[%s1321_s2 + $0x48] sm:$0xff] %v520_v40 }
  0xec   :  { %v470_v41 = vpop.f32.mrf.mxu2 }
  0xed   :  { %v559_v42 = vpop.f32.mrf.mxu3 }
  0xee   :  { %v560_v43 = vadd.f32 %v559_v42, %v470_v41  ;;  %v433_v44 = vpop.f32.mrf.mxu0 }
  0xef   :  { %v522_v45 = vpop.f32.mrf.mxu1 }
  0xf0   :  { %701 = vst [vmem:[%s1321_s2 + $0xc8] sm:$0xff] %v560_v43  ;;  %v523_v46 = vadd.f32 %v522_v45, %v433_v44 }
  0xf2   :  { %686 = vst [vmem:[%s1321_s2 + $0x50] sm:$0xff] %v523_v46 }
  0xf4   :  { %v473_v47 = vpop.f32.mrf.mxu2 }
  0xf5   :  { %v562_v48 = vpop.f32.mrf.mxu3 }
  0xf6   :  { %v563_v49 = vadd.f32 %v562_v48, %v473_v47  ;;  %v435_v50 = vpop.f32.mrf.mxu0 }
  0xf7   :  { %v524_v51 = vpop.f32.mrf.mxu1 }
  0xf8   :  { %702 = vst [vmem:[%s1321_s2 + $0xd0] sm:$0xff] %v563_v49  ;;  %v525_v52 = vadd.f32 %v524_v51, %v435_v50 }
  0xfa   :  { %687 = vst [vmem:[%s1321_s2 + $0x58] sm:$0xff] %v525_v52 }
  0xfc   :  { %v475_v53 = vpop.f32.mrf.mxu2 }
  0xfd   :  { %v564_v54 = vpop.f32.mrf.mxu3 }
  0xfe   :  { %v565_v55 = vadd.f32 %v564_v54, %v475_v53  ;;  %v438_v56 = vpop.f32.mrf.mxu0 }
  0xff   :  { %v527_v57 = vpop.f32.mrf.mxu1 }
 0x100   :  { %703 = vst [vmem:[%s1321_s2 + $0xd8] sm:$0xff] %v565_v55  ;;  %v528_v58 = vadd.f32 %v527_v57, %v438_v56 }
 0x102   :  { %688 = vst [vmem:[%s1321_s2 + $0x60] sm:$0xff] %v528_v58 }
 0x104   :  { %v478_v59 = vpop.f32.mrf.mxu2 }
 0x105   :  { %v567_v60 = vpop.f32.mrf.mxu3 }
 0x106   :  { %v568_v61 = vadd.f32 %v567_v60, %v478_v59  ;;  %v440_v62 = vpop.f32.mrf.mxu0 }
 0x107   :  { %v529_v63 = vpop.f32.mrf.mxu1 }
 0x108   :  { %704 = vst [vmem:[%s1321_s2 + $0xe0] sm:$0xff] %v568_v61  ;;  %v530_v0 = vadd.f32 %v529_v63, %v440_v62 }
 0x10a   :  { %689 = vst [vmem:[%s1321_s2 + $0x68] sm:$0xff] %v530_v0 }
 0x10c   :  { %v480_v1 = vpop.f32.mrf.mxu2 }
 0x10d   :  { %v569_v2 = vpop.f32.mrf.mxu3 }
 0x10e   :  { %v570_v3 = vadd.f32 %v569_v2, %v480_v1  ;;  %v443_v4 = vpop.f32.mrf.mxu0 }
 0x10f   :  { %v532_v5 = vpop.f32.mrf.mxu1 }
 0x110   :  { %705 = vst [vmem:[%s1321_s2 + $0xe8] sm:$0xff] %v570_v3  ;;  %v533_v6 = vadd.f32 %v532_v5, %v443_v4 }
 0x112   :  { %690 = vst [vmem:[%s1321_s2 + $0x70] sm:$0xff] %v533_v6 }
 0x114   :  { %v483_v7 = vpop.f32.mrf.mxu2 }
 0x115   :  { %v572_v8 = vpop.f32.mrf.mxu3 }
 0x116   :  { %v573_v9 = vadd.f32 %v572_v8, %v483_v7  ;;  %v445_v10 = vpop.f32.mrf.mxu0 }
 0x117   :  { %v534_v11 = vpop.f32.mrf.mxu1 }
 0x118   :  { %706 = vst [vmem:[%s1321_s2 + $0xf0] sm:$0xff] %v573_v9  ;;  %v535_v12 = vadd.f32 %v534_v11, %v445_v10 }
 0x11a   :  { %691 = vst [vmem:[%s1321_s2 + $0x78] sm:$0xff] %v535_v12 }
 0x11c   :  { %v485_v13 = vpop.f32.mrf.mxu2 }
 0x11d   :  { %v574_v14 = vpop.f32.mrf.mxu3 }
 0x11e   :  { %v575_v15 = vadd.f32 %v574_v14, %v485_v13 }
 0x120   :  { %707 = vst [vmem:[%s1321_s2 + $0xf8] sm:$0xff] %v575_v15 }

</bundles_post_ra>
